<compile_context>
chip_gen: v5e
topology: v5e:2x2
jax: 0.10.0
libtpu: 0.0.40
codegen_flags: <defaults>
</compile_context>

<pallas_src>
import jax
import jax.numpy as jnp
from jax.experimental import pallas as pl
from jax.experimental.pallas import tpu as pltpu

_LANE = 128
_MAX_TILE_HW = 2048                      # lanes; amortizes per-step overhead
_VMEM_BLOCK_BUDGET = 24 * 1024 * 1024    # bytes for double-buffered in+out blocks
_VMEM_LIMIT_BYTES = 48 * 1024 * 1024     # scoped VMEM limit (< 64 MiB v7x physical)
_PALLAS_MIN_BYTES = 1 << 20              # below this, pure-JAX path wins


def _mbstd_kernel(x_ref, o_ref):
    # x_ref: (N, C, TILE_HW) in VMEM, o_ref: (N, C+1, TILE_HW) in VMEM
    x = x_ref[...]
    n, c, t = x.shape

    # Stats in f32 (important for bf16/fp16 inputs; v5e has no bf16 VPU).
    xf = x.astype(jnp.float32)
    mean0 = jnp.mean(xf, axis=0, keepdims=True)                 # (1, C, T)
    var = jnp.mean((xf - mean0) ** 2, axis=0, keepdims=True)    # (1, C, T)
    std = jnp.sqrt(var + 1e-8)                                  # (1, C, T)
    vals = jnp.mean(std, axis=1, keepdims=True)                 # (1, 1, T)

    # Copy x into the first C output channels, broadcast vals into channel C.
    o_ref[:, :c, :] = x.astype(o_ref.dtype)
    o_ref[:, c:, :] = jnp.broadcast_to(vals, (n, 1, t)).astype(o_ref.dtype)


def _round_up(a, b):
    return ((a + b - 1) // b) * b


def minibatch_std_concat(x, *, use_pallas=None):
    """x: (N, C, H, W) -> (N, C+1, H, W) (averaging='all')."""
    n, c, h, w = x.shape
    hw = h * w
    itemsize = jnp.dtype(x.dtype).itemsize

    if use_pallas is None:
        use_pallas = (n * c * hw * itemsize) >= _PALLAS_MIN_BYTES
    if not use_pallas:
        return _reference(x)

    x2 = x.reshape(n, c, hw)

    # --- tile sizing: largest 128-multiple lane tile within the VMEM budget ---
    # double-buffered input block + output block, assume 4B/elt for headroom
    bytes_per_lane_col = 2 * (n * c + n * (c + 1)) * 4
    tile = max(_LANE, (_VMEM_BLOCK_BUDGET // bytes_per_lane_col) // _LANE * _LANE)
    tile = min(tile, _MAX_TILE_HW, _round_up(hw, _LANE))

    # pad HW so the grid tiles exactly and all stores are unmasked vst
    hw_pad = _round_up(hw, tile)
    if hw_pad != hw:
        x2 = jnp.pad(x2, ((0, 0), (0, 0), (0, hw_pad - hw)))

    grid = (hw_pad // tile,)

    cost = pl.CostEstimate(
        flops=4 * n * c * hw_pad,            # sub, square, two means (approx)
        transcendentals=c * hw_pad,          # sqrt
        bytes_accessed=(n * c * hw_pad + n * (c + 1) * hw_pad) * itemsize,
    )

    out = pl.pallas_call(
        _mbstd_kernel,
        out_shape=jax.ShapeDtypeStruct((n, c + 1, hw_pad), x.dtype),
        grid=grid,
        in_specs=[pl.BlockSpec((n, c, tile), lambda i: (0, 0, i))],
        out_specs=pl.BlockSpec((n, c + 1, tile), lambda i: (0, 0, i)),
        compiler_params=pltpu.CompilerParams(
            dimension_semantics=("parallel",),
            vmem_limit_bytes=_VMEM_LIMIT_BYTES,
        ),
        cost_estimate=cost,
    )(x2)

    out = out[:, :, :hw]
    return out.reshape(n, c + 1, h, w)


def _reference(x):
    xf = x.astype(jnp.float32)
    mean0 = jnp.mean(xf, axis=0, keepdims=True)
    std = jnp.sqrt(jnp.mean((xf - mean0) ** 2, axis=0, keepdims=True) + 1e-8)
    vals = jnp.mean(std, axis=1, keepdims=True)                 # (1,1,H,W)
    vals = jnp.broadcast_to(vals, (x.shape[0], 1, x.shape[2], x.shape[3]))
    return jnp.concatenate([x, vals.astype(x.dtype)], axis=1)


if __name__ == "__main__":
    key = jax.random.PRNGKey(0)

    # Demo shape from the module spec (HW = 256, a 128 multiple -> 1 grid step).
    x = jax.random.normal(key, (2, 4, 16, 16), dtype=jnp.float32)
    out = jax.block_until_ready(minibatch_std_concat(x, use_pallas=True))
    ref = _reference(x)
    assert out.shape == (2, 5, 16, 16), out.shape
    assert jnp.allclose(out, ref, atol=1e-5, rtol=1e-5), "mismatch vs reference"

    # Second check: ragged HW (10*10 = 100) exercises the lane-padding path.
    x2 = jax.random.normal(jax.random.PRNGKey(1), (4, 8, 10, 10), dtype=jnp.float32)
    out2 = jax.block_until_ready(minibatch_std_concat(x2, use_pallas=True))
    ref2 = _reference(x2)
    assert out2.shape == (4, 9, 10, 10), out2.shape
    assert jnp.allclose(out2, ref2, atol=1e-5, rtol=1e-5), "mismatch vs reference (padded)"

    # TODO(synk): averaging modes other than 'all' ('spatial', 'none', 'gpool',
    # 'group<n>') are not implemented; the reference module defaults to 'all'.
    print("KERNEL_OK")
</pallas_src>

<mosaic_0001>
module attributes {stable_mosaic.version = 11 : i64} {
  func.func @_mbstd_kernel(%arg0: i32, %arg1: memref<2x4x256xf32, #tpu.memory_space<vmem>>, %arg2: memref<2x5x256xf32, #tpu.memory_space<vmem>>) attributes {dimension_semantics = [#tpu.dimension_semantics<parallel>], iteration_bounds = array<i64: 1>, scalar_prefetch = 0 : i64, scratch_operands = 0 : i64, tpu.core_type = #tpu.core_type<tc>, window_params = [{transform_indices = @transform_0, window_bounds = array<i64: 2, 4, 256>}, {transform_indices = @transform_1, window_bounds = array<i64: 2, 5, 256>}]} {
    %c0 = arith.constant 0 : index
    %c0_0 = arith.constant 0 : index
    %c0_1 = arith.constant 0 : index
    %0 = vector.load %arg1[%c0, %c0_0, %c0_1] : memref<2x4x256xf32, #tpu.memory_space<vmem>>, vector<2x4x256xf32>
    %cst = arith.constant dense<0.000000e+00> : vector<4x256xf32>
    %1 = vector.multi_reduction <add>, %0, %cst [0] : vector<2x4x256xf32> to vector<4x256xf32>
    %2 = vector.shape_cast %1 : vector<4x256xf32> to vector<1x4x256xf32>
    %cst_2 = arith.constant 2.000000e+00 : f32
    %3 = vector.broadcast %cst_2 : f32 to vector<1x4x256xf32>
    %4 = arith.divf %2, %3 : vector<1x4x256xf32>
    %5 = vector.broadcast %4 : vector<1x4x256xf32> to vector<2x4x256xf32>
    %6 = arith.subf %0, %5 : vector<2x4x256xf32>
    %7 = arith.mulf %6, %6 : vector<2x4x256xf32>
    %cst_3 = arith.constant dense<0.000000e+00> : vector<4x256xf32>
    %8 = vector.multi_reduction <add>, %7, %cst_3 [0] : vector<2x4x256xf32> to vector<4x256xf32>
    %9 = vector.shape_cast %8 : vector<4x256xf32> to vector<1x4x256xf32>
    %cst_4 = arith.constant 2.000000e+00 : f32
    %10 = vector.broadcast %cst_4 : f32 to vector<1x4x256xf32>
    %11 = arith.divf %9, %10 : vector<1x4x256xf32>
    %cst_5 = arith.constant 9.99999993E-9 : f32
    %12 = vector.broadcast %cst_5 : f32 to vector<1x4x256xf32>
    %13 = arith.addf %11, %12 : vector<1x4x256xf32>
    %14 = math.sqrt %13 : vector<1x4x256xf32>
    %cst_6 = arith.constant dense<0.000000e+00> : vector<1x256xf32>
    %15 = vector.multi_reduction <add>, %14, %cst_6 [1] : vector<1x4x256xf32> to vector<1x256xf32>
    %16 = vector.shape_cast %15 : vector<1x256xf32> to vector<1x1x256xf32>
    %cst_7 = arith.constant 4.000000e+00 : f32
    %17 = vector.broadcast %cst_7 : f32 to vector<1x1x256xf32>
    %18 = arith.divf %16, %17 : vector<1x1x256xf32>
    %c0_8 = arith.constant 0 : index
    %c0_9 = arith.constant 0 : index
    %c0_10 = arith.constant 0 : index
    %19 = vector.load %arg2[%c0_8, %c0_9, %c0_10] : memref<2x5x256xf32, #tpu.memory_space<vmem>>, vector<2x4x256xf32>
    tpu.vector_store %arg2[%c0_8, %c0_9, %c0_10], %0 {strides = array<i32>} : memref<2x5x256xf32, #tpu.memory_space<vmem>>, vector<2x4x256xf32>,
    %20 = vector.shape_cast %18 : vector<1x1x256xf32> to vector<1x1x256xf32>
    %21 = vector.broadcast %20 : vector<1x1x256xf32> to vector<2x1x256xf32>
    %c0_11 = arith.constant 0 : index
    %c4 = arith.constant 4 : index
    %c0_12 = arith.constant 0 : index
    %22 = vector.load %arg2[%c0_11, %c4, %c0_12] : memref<2x5x256xf32, #tpu.memory_space<vmem>>, vector<2x1x256xf32>
    tpu.vector_store %arg2[%c0_11, %c4, %c0_12], %21 {strides = array<i32>} : memref<2x5x256xf32, #tpu.memory_space<vmem>>, vector<2x1x256xf32>,
    return
  }
  func.func @transform_0(%arg0: i32) -> (i32, i32, i32) {
    %c0_i32 = arith.constant 0 : i32
    %c0_i32_0 = arith.constant 0 : i32
    %c0_i32_1 = arith.constant 0 : i32
    return %c0_i32, %c0_i32_0, %arg0 : i32, i32, i32
  }
  func.func @transform_1(%arg0: i32) -> (i32, i32, i32) {
    %c0_i32 = arith.constant 0 : i32
    %c0_i32_0 = arith.constant 0 : i32
    %c0_i32_1 = arith.constant 0 : i32
    return %c0_i32, %c0_i32_0, %arg0 : i32, i32, i32
  }
}

</mosaic_0001>

<bundles_post_ra>
// kernel: tpu_custom_call.1
= control target key start
LH: loop header
LB: loop body
LE: loop exit
PB: predicated region body
PF: predicated region fallthrough
CT: control target
= control target key end

     0   :  { %6 = vsyncpa [#allocation3], 0  ;;  %s211_s9 = smov [#allocation2]   ;;  %s212_s11 = smov 128   ;;  %s258_s0 = inlined_call_operand.hbm [shape: f32[2,4,256], index: 0, kind: input, shape index: {}]   ;;  %s259_s1 = inlined_call_operand.vmem [shape: f32[2,5,256], index: 1, kind: output, shape index: {}]  }
   0x1   :  { %s11_s8 = sshll.u32 %s258_s0, 4  ;;  %s13_s10 = sshll.u32 %s211_s9, 4  ;;  %s12_s8 = int_to_ptr.hbm [resolvable:$true] %s11_s8  ;;  %s14_s10 = int_to_ptr.vmem [resolvable:$true] %s13_s10 }
   0x2   :  { %s213_s12 = smov 8  }
   0x3   :  { %19 = dma.hbm_to_vmem [thread:$0]  %s12_s8, 256, %s14_s10, [#allocation3], %s212_s11, %s212_s11, %s213_s12  }
   0x4   :  { %209 = dma.done.wait [#allocation3], 256  }
   0x5   :  { %210 = vsyncadd [#allocation3], 4294967040  ;;  %v214_v0 = vmov 2.0   ;;  %v24_v2 = vld [vmem:[#allocation2] sm:$0xff]  ;;  %v25_v3 = vld [vmem:[#allocation2 + $0x8] sm:$0xff]  ;;  %vm39_vm1 = vcmask 1043456  }
   0x6   :  { %177 = vrcp.f32 %v214_v0  ;;  %28 = vst [vmem:[#allocation1] ss:$2 sm:$0xff] %v24_v2  ;;  %v215_v48 = vmov 4.0   ;;  %vm152_vm7 = vcmask 1040384  }
   0x7   :  { %32 = vst [vmem:[#allocation1 + $0x10] ss:$2 sm:$0xff] %v25_v3 }
   0xc   :  { %v178_v1 = vpop.eup %177 }
   0xd   :  { %v47_v4 = vmul.f32 2.0, %v178_v1  ;;  %vm51_vm0 = vweird.f32 %v178_v1  ;;  %v29_v8 = vld.sshfl [vmem:[#allocation1] sm:$0xff pattern:$0x75316420] }
   0xe   :  { %v30_v9 = vld.sshfl [vmem:[#allocation1 + $0x8] sm:$0xff pattern:$0x75316420]  ;;  %v33_v10 = vld.sshfl [vmem:[#allocation1 + $0x10] sm:$0xff pattern:$0x75316420] }
   0xf   :  { %v48_v5 = vsub.f32 1.0, %v47_v4  ;;  %v34_v11 = vld.sshfl [vmem:[#allocation1 + $0x18] sm:$0xff pattern:$0x75316420]  ;;  %v40_v13 = vsel %vm39_vm1, %v29_v8, 0.0  ;;  %v41_v14 = vsel %vm39_vm1, %v33_v10, 0.0 }
  0x10   :  { %v43_v15 = vsel %vm39_vm1, %v30_v9, 0.0  ;;  %v44_v16 = vsel %vm39_vm1, %v34_v11, 0.0  ;;  %v42_v17 = vadd.f32 %v41_v14, %v40_v13 }
  0x11   :  { %v49_v6 = vmul.f32 %v178_v1, %v48_v5  ;;  %v45_v18 = vadd.f32 %v44_v16, %v43_v15 }
  0x13   :  { %v50_v7 = vadd.f32 %v178_v1, %v49_v6 }
  0x15   :  { %v52_v12 = vsel %vm51_vm0, %v178_v1, %v50_v7 }
  0x16   :  { %v54_v19 = vmul.f32 %v52_v12, %v45_v18  ;;  %v53_v20 = vmul.f32 %v52_v12, %v42_v17 }
  0x18   :  { %v57_v21 = vrot.slane %v54_v19, 4 }
  0x1a   :  { %v58_v22 = vsel %vm39_vm1, %v53_v20, %v57_v21 }
  0x1b   :  { %v60_v23 = vsub.f32 %v24_v2, %v58_v22  ;;  %v61_v24 = vsub.f32 %v25_v3, %v58_v22  ;;  %v155_v22 = vlaneseq }
  0x1d   :  { %v62_v25 = vmul.f32 %v60_v23, %v60_v23  ;;  %v63_v26 = vmul.f32 %v61_v24, %v61_v24  ;;  %vm157_vm8 = vcmp.lt.s32.totalorder %v155_v22, 256 }
  0x1f   :  { %66 = vst [vmem:[#allocation1] ss:$2 sm:$0xff] %v62_v25 }
  0x20   :  { %70 = vst [vmem:[#allocation1 + $0x10] ss:$2 sm:$0xff] %v63_v26 }
  0x26   :  { %v67_v27 = vld.sshfl [vmem:[#allocation1] sm:$0xff pattern:$0x75316420]  ;;  %v68_v28 = vld.sshfl [vmem:[#allocation1 + $0x8] sm:$0xff pattern:$0x75316420] }
  0x27   :  { %v77_v29 = vsel %vm39_vm1, %v67_v27, 0.0  ;;  %v80_v30 = vsel %vm39_vm1, %v68_v28, 0.0  ;;  %134 = vst [vmem:[#allocation1] ss:$2 sm:$0xff] %v24_v2 }
  0x28   :  { %v71_v31 = vld.sshfl [vmem:[#allocation1 + $0x10] sm:$0xff pattern:$0x75316420]  ;;  %v72_v32 = vld.sshfl [vmem:[#allocation1 + $0x18] sm:$0xff pattern:$0x75316420] }
  0x29   :  { %v78_v33 = vsel %vm39_vm1, %v71_v31, 0.0  ;;  %v81_v34 = vsel %vm39_vm1, %v72_v32, 0.0  ;;  %138 = vst [vmem:[#allocation1 + $0x10] ss:$2 sm:$0xff] %v25_v3 }
  0x2a   :  { %v79_v35 = vadd.f32 %v78_v33, %v77_v29  ;;  %v82_v36 = vadd.f32 %v81_v34, %v80_v30 }
  0x2c   :  { %v83_v37 = vmul.f32 %v79_v35, %v52_v12  ;;  %v84_v38 = vmul.f32 %v82_v36, %v52_v12 }
  0x2e   :  { %v85_v39 = vadd.f32 1e-08, %v83_v37  ;;  %v86_v40 = vadd.f32 1e-08, %v84_v38 }
  0x2f   :  { %v135_v41 = vld.sshfl [vmem:[#allocation1] sm:$0xff pattern:$0x75316420]  ;;  %v136_v42 = vld.sshfl [vmem:[#allocation1 + $0x8] sm:$0xff pattern:$0x75316420] }
  0x30   :  { %145 = vst [vmem:[%s259_s1] sm:$0xf] %v135_v41  ;;  %v139_v43 = vld.sshfl [vmem:[#allocation1 + $0x10] sm:$0xff pattern:$0x75316420]  ;;  %179 = vrsqrt.f32 %v85_v39  ;;  %vm94_vm2 = vcmp.eq.f32.partialorder %v85_v39, inf  ;;  %v97_v61 = vand.u32 2147483648, %v85_v39 }
  0x31   :  { %146 = vst [vmem:[%s259_s1 + $0x8] sm:$0xf] %v136_v42  ;;  %v140_v44 = vld.sshfl [vmem:[#allocation1 + $0x18] sm:$0xff pattern:$0x75316420]  ;;  %181 = vrsqrt.f32 %v86_v40  ;;  %vm96_vm3 = vcmp.eq.f32.partialorder %v85_v39, 0.0 }
  0x32   :  { %147 = vst [vmem:[%s259_s1 + $0x10] sm:$0xf] %v139_v43  ;;  %183 = vrcp.f32 %v215_v48  ;;  %vm106_vm4 = vcmp.eq.f32.partialorder %v86_v40, inf  ;;  %v109_v0 = vand.u32 2147483648, %v86_v40  ;;  %vm108_vm5 = vcmp.eq.f32.partialorder %v86_v40, 0.0 }
  0x33   :  { %148 = vst [vmem:[%s259_s1 + $0x18] sm:$0xf] %v140_v44 }
  0x36   :  { %v180_v45 = vpop.eup %179 }
  0x37   :  { %v182_v46 = vpop.eup %181  ;;  %v88_v47 = vmul.f32 %v180_v45, %v85_v39 }
  0x38   :  { %v100_v49 = vmul.f32 %v182_v46, %v86_v40  ;;  %v184_v54 = vpop.eup %183 }
  0x39   :  { %v89_v50 = vmul.f32 %v180_v45, %v88_v47  ;;  %v126_v59 = vmul.f32 4.0, %v184_v54  ;;  %vm130_vm6 = vweird.f32 %v184_v54 }
  0x3a   :  { %v101_v51 = vmul.f32 %v182_v46, %v100_v49 }
  0x3b   :  { %v90_v52 = vmul.f32 0.5, %v89_v50  ;;  %v127_v3 = vsub.f32 1.0, %v126_v59 }
  0x3c   :  { %v102_v53 = vmul.f32 0.5, %v101_v51 }
  0x3d   :  { %v91_v55 = vsub.f32 1.5, %v90_v52  ;;  %v128_v10 = vmul.f32 %v184_v54, %v127_v3 }
  0x3e   :  { %v103_v56 = vsub.f32 1.5, %v102_v53 }
  0x3f   :  { %v92_v57 = vmul.f32 %v180_v45, %v91_v55  ;;  %v129_v15 = vadd.f32 %v184_v54, %v128_v10 }
  0x40   :  { %v104_v58 = vmul.f32 %v182_v46, %v103_v56 }
  0x41   :  { %v93_v60 = vmul.f32 %v92_v57, %v85_v39  ;;  %v131_v19 = vsel %vm130_vm6, %v184_v54, %v129_v15 }
  0x42   :  { %v105_v62 = vmul.f32 %v104_v58, %v86_v40 }
  0x43   :  { %v95_v63 = vsel %vm94_vm2, %v85_v39, %v93_v60 }
  0x44   :  { %v98_v1 = vsel %vm96_vm3, %v97_v61, %v95_v63  ;;  %v107_v2 = vsel %vm106_vm4, %v86_v40, %v105_v62 }
  0x45   :  { %v110_v4 = vsel %vm108_vm5, %v109_v0, %v107_v2  ;;  %v111_v5 = vsel %vm39_vm1, %v98_v1, 0.0 }
  0x46   :  { %v112_v6 = vrot.slane %v111_v5, 4  ;;  %v118_v7 = vsel %vm39_vm1, %v110_v4, 0.0 }
  0x47   :  { %v119_v8 = vrot.slane %v118_v7, 4 }
  0x48   :  { %v113_v9 = vadd.f32 %v112_v6, %v111_v5 }
  0x49   :  { %v120_v11 = vadd.f32 %v119_v8, %v118_v7 }
  0x4a   :  { %v114_v12 = vrot.slane %v113_v9, 2 }
  0x4b   :  { %v121_v13 = vrot.slane %v120_v11, 2 }
  0x4c   :  { %v115_v14 = vadd.f32 %v114_v12, %v113_v9 }
  0x4d   :  { %v122_v16 = vadd.f32 %v121_v13, %v120_v11 }
  0x4e   :  { %v116_v17 = vrot.slane %v115_v14, 1 }
  0x4f   :  { %v123_v18 = vrot.slane %v122_v16, 1 }
  0x50   :  { %v117_v20 = vadd.f32 %v116_v17, %v115_v14 }
  0x51   :  { %v124_v21 = vadd.f32 %v123_v18, %v122_v16 }
  0x52   :  { %v132_v24 = vmul.f32 %v131_v19, %v117_v20 }
  0x53   :  { %v133_v23 = vmul.f32 %v131_v19, %v124_v21 }
  0x55   :  { %v151_v25 = vrot.slane %v133_v23, 7 }
  0x57   :  { %v153_v26 = vsel %vm152_vm7, %v132_v24, %v151_v25 }
  0x58   :  { %170 = vst.msk [vmem:[%s259_s1 + $0x4] ss:$8 sm:$0x3] %vm157_vm8, %v153_v26 }
  0x59   :  { %171 = vst.msk [vmem:[%s259_s1 + $0x14] ss:$8 sm:$0x3] %vm157_vm8, %v153_v26 }
  0x5a   :  { %169 = vsyncpa [#allocation3], 1 }

</bundles_post_ra>
